<compile_context>
chip_gen: v6e
topology: v6e:2x2x1
jax: 0.10.0
libtpu: 0.0.40
codegen_flags: <defaults>
</compile_context>

<pallas_src>
import functools

import jax
import jax.numpy as jnp
from jax.experimental import pallas as pl
from jax.experimental.pallas import tpu as pltpu


def _round_up(x, m):
    return ((x + m - 1) // m) * m


def _cdiv(a, b):
    return -(-a // b)


# ---------------------------------------------------------------------------
# Pallas kernel: per-(batch, pixel-tile) GEMM with bias epilogue.
#   w   : (Cout, Kd)  bf16   Kd = K*K*C, carried whole (no reduction axis)
#   b   : (Cout, 1)   f32
#   x   : (Kd, tn)    bf16   tap-major patches, output pixels on lanes
#   out : (Cout, tn)  f32    lane-dense for any Cout
# ---------------------------------------------------------------------------
def _conv_gemm_kernel(w_ref, b_ref, x_ref, o_ref):
    acc = jnp.dot(w_ref[...], x_ref[...], preferred_element_type=jnp.float32)
    o_ref[...] = (acc + b_ref[...]).astype(o_ref.dtype)


def _gemm_plan(mpix, kdim, cout, nbatch):
    """Pick the pixel tile (tn), padded pixel count and the vmem limit."""
    try:
        vmem_cap = int(pltpu.get_tpu_info().vmem_capacity_bytes)
    except Exception:
        vmem_cap = 64 * 1024 * 1024            # conservative (v7x-class)
    budget = max(8 << 20, vmem_cap // 5)       # working-set budget
    vmem_limit = min(vmem_cap // 2, 64 << 20)  # 64 MiB on v5e/v6e, 32 MiB on v7x

    if mpix <= 128:                            # single full-width tile
        return mpix, mpix, vmem_limit

    per_col = 2 * kdim * 2 + 2 * cout * 4            # dbl-buffered x + out tiles
    resident = 2 * cout * kdim * 2 + 2 * cout * 4    # weights + bias
    cap = (budget - resident) // per_col
    cap = max(128, min(2048, (cap // 128) * 128))

    m128 = _round_up(mpix, 128)
    n_tiles = _cdiv(m128, cap)
    # v7x-class parts (64 MiB VMEM, 2 TensorCores): keep >= 2 parallel grid
    # steps even for a single-image batch; don't force a split on v5e/v6e.
    if vmem_cap <= (64 << 20) and nbatch == 1 and m128 >= 256:
        n_tiles = max(n_tiles, 2)
    tn = _round_up(_cdiv(mpix, n_tiles), 128)   # minimize lane zero-padding
    return tn, n_tiles * tn, vmem_limit


def _pallas_conv_gemm(w2d, b2d, xcol, *, tn, vmem_limit):
    nb, kdim, mpad = xcol.shape
    cout = w2d.shape[0]
    assert mpad % tn == 0
    return pl.pallas_call(
        _conv_gemm_kernel,
        out_shape=jax.ShapeDtypeStruct((nb, cout, mpad), jnp.float32),
        grid_spec=pltpu.PrefetchScalarGridSpec(
            num_scalar_prefetch=0,
            grid=(nb, mpad // tn),
            in_specs=[
                pl.BlockSpec((cout, kdim), lambda b, j: (0, 0)),   # resident W
                pl.BlockSpec((cout, 1), lambda b, j: (0, 0)),      # resident bias
                pl.BlockSpec((None, kdim, tn), lambda b, j: (b, 0, j)),
            ],
            out_specs=pl.BlockSpec((None, cout, tn), lambda b, j: (b, 0, j)),
        ),
        compiler_params=pltpu.CompilerParams(
            dimension_semantics=("parallel", "parallel"),
            vmem_limit_bytes=vmem_limit,
        ),
    )(w2d, b2d, xcol)


@functools.partial(jax.jit, static_argnames=("kernel_size", "stride"))
def sp_conv2d(x, weight, bias, *, kernel_size, stride):
    """Forward pass of SpConv2d.

    x      : (N, C, H, W) float32 (NCHW, as PyTorch)
    weight : (Cout, Cin, K, K)
    bias   : (Cout,)
    returns: (N, Cout, Ho, Wo) float32
    """
    n, c, h, w = x.shape
    assert c % 4 == 0
    q = c // 4
    k = kernel_size
    s = stride
    cout = weight.shape[0]
    pad = int((kernel_size - 2) / 2)            # same formula as the PyTorch module

    # ---- glue (XLA, bf16, NCHW): shift-pad the 4 channel groups + conv pad.
    xb = x.astype(jnp.bfloat16)                 # cast early: halves glue HBM bytes
    e = 1 + pad
    xa = jnp.pad(xb, ((0, 0), (0, 0), (e, e), (e, e)))
    hp, wp = h + 1 + 2 * pad, w + 1 + 2 * pad   # shift-padded + conv-padded frame
    xp = jnp.concatenate([
        xa[:, 0 * q:1 * q, 0:hp,     0:wp],      # pad (l=1, t=1)
        xa[:, 1 * q:2 * q, 0:hp,     1:wp + 1],  # pad (r=1, t=1)
        xa[:, 2 * q:3 * q, 1:hp + 1, 0:wp],      # pad (l=1, b=1)
        xa[:, 3 * q:4 * q, 1:hp + 1, 1:wp + 1],  # pad (r=1, b=1)
    ], axis=1)                                   # (N, C, hp, wp) bf16

    ho = (hp - k) // s + 1
    wo = (wp - k) // s + 1
    mpix = ho * wo
    kdim = k * k * c

    # ---- glue (XLA, bf16): tap-major patches (transposed im2col).
    # For kernel_size == stride this carries exactly the input's bytes.
    # TODO(synk): fuse this gather into the kernel (strided / Element DMAs).
    taps = [xp[:, :, kh:kh + s * (ho - 1) + 1:s, kw:kw + s * (wo - 1) + 1:s]
            for kh in range(k) for kw in range(k)]            # each (N, C, ho, wo)
    xcol = jnp.stack(taps, axis=1).reshape(n, kdim, mpix)     # (N, K*K*C, Ho*Wo)

    # weight (Cout, Cin, K, K) -> (Cout, K*K*C), matching xcol row order (kh,kw,c)
    w2d = jnp.transpose(weight, (0, 2, 3, 1)).reshape(cout, kdim).astype(jnp.bfloat16)
    b2d = bias.astype(jnp.float32).reshape(cout, 1)

    tn, mpad, vmem_limit = _gemm_plan(mpix, kdim, cout, n)
    if mpad != mpix:
        xcol = jnp.pad(xcol, ((0, 0), (0, 0), (0, mpad - mpix)))

    out = _pallas_conv_gemm(w2d, b2d, xcol, tn=tn, vmem_limit=vmem_limit)
    if mpad != mpix:
        out = out[:, :, :mpix]
    return out.reshape(n, cout, ho, wo)          # already NCHW: no transpose


if __name__ == "__main__":
    # Module config: SpConv2d(in_channels=4, out_channels=8, kernel_size=2, stride=2)
    in_channels, out_channels, kernel_size, stride = 4, 8, 2, 2
    N, H, W = 2, 16, 16

    key = jax.random.PRNGKey(0)
    kx, kw_, kb = jax.random.split(key, 3)
    x = jax.random.normal(kx, (N, in_channels, H, W), dtype=jnp.float32)
    weight = jax.random.normal(
        kw_, (out_channels, in_channels, kernel_size, kernel_size),
        dtype=jnp.float32) * 0.1
    bias = jax.random.normal(kb, (out_channels,), dtype=jnp.float32) * 0.1

    out = sp_conv2d(x, weight, bias, kernel_size=kernel_size, stride=stride)
    out = jax.block_until_ready(out)

    # Reference: XLA conv on the shift-padded tensor.  Operands are rounded to
    # bf16 (the precision the kernel feeds the MXU); accumulation is f32 in
    # both, so the comparison isolates kernel correctness from quantization.
    xr = x.astype(jnp.bfloat16).astype(jnp.float32)
    wr = weight.astype(jnp.bfloat16).astype(jnp.float32)
    q = in_channels // 4
    pad = int((kernel_size - 2) / 2)
    x1 = jnp.pad(xr[:, 0 * q:1 * q], ((0, 0), (0, 0), (1, 0), (1, 0)))
    x2 = jnp.pad(xr[:, 1 * q:2 * q], ((0, 0), (0, 0), (1, 0), (0, 1)))
    x3 = jnp.pad(xr[:, 2 * q:3 * q], ((0, 0), (0, 0), (0, 1), (1, 0)))
    x4 = jnp.pad(xr[:, 3 * q:4 * q], ((0, 0), (0, 0), (0, 1), (0, 1)))
    xps = jnp.concatenate([x1, x2, x3, x4], axis=1)
    ref = jax.lax.conv_general_dilated(
        xps, wr, window_strides=(stride, stride),
        padding=[(pad, pad), (pad, pad)],
        dimension_numbers=("NCHW", "OIHW", "NCHW"),
        precision=jax.lax.Precision.HIGHEST) + bias[None, :, None, None]

    assert out.shape == ref.shape, (out.shape, ref.shape)
    max_err = float(jnp.max(jnp.abs(out - ref)))
    assert jnp.allclose(out, ref, atol=1e-3, rtol=1e-3), max_err
    print("KERNEL_OK")
</pallas_src>

<mosaic_0001>
module attributes {stable_mosaic.version = 11 : i64} {
  func.func @_conv_gemm_kernel(%arg0: i32, %arg1: i32, %arg2: memref<8x16xbf16, #tpu.memory_space<vmem>>, %arg3: memref<8x1xf32, #tpu.memory_space<vmem>>, %arg4: memref<1x16x64xbf16, #tpu.memory_space<vmem>>, %arg5: memref<1x8x64xf32, #tpu.memory_space<vmem>>) attributes {dimension_semantics = [#tpu.dimension_semantics<parallel>, #tpu.dimension_semantics<parallel>], iteration_bounds = array<i64: 2, 1>, scalar_prefetch = 0 : i64, scratch_operands = 0 : i64, tpu.core_type = #tpu.core_type<tc>, window_params = [{pipeline_mode = #tpu.pipeline_mode<synchronous>, transform_indices = @transform_0, window_bounds = array<i64: 8, 16>}, {pipeline_mode = #tpu.pipeline_mode<synchronous>, transform_indices = @transform_1, window_bounds = array<i64: 8, 1>}, {transform_indices = @transform_2, window_bounds = array<i64: 1, 16, 64>}, {transform_indices = @transform_3, window_bounds = array<i64: 1, 8, 64>}]} {
    %c0 = arith.constant 0 : index
    %c0_0 = arith.constant 0 : index
    %0 = vector.load %arg2[%c0, %c0_0] : memref<8x16xbf16, #tpu.memory_space<vmem>>, vector<8x16xbf16>
    %c0_1 = arith.constant 0 : index
    %c0_2 = arith.constant 0 : index
    %c0_3 = arith.constant 0 : index
    %1 = vector.load %arg4[%c0_1, %c0_2, %c0_3] : memref<1x16x64xbf16, #tpu.memory_space<vmem>>, vector<1x16x64xbf16>
    %2 = vector.shape_cast %1 : vector<1x16x64xbf16> to vector<16x64xbf16>
    %cst = arith.constant dense<0.000000e+00> : vector<8x64xf32>
    %3 = tpu.matmul %0, %2, %cst {dimension_numbers = #tpu.dot_dimension_numbers<[1], [0], [0], [1], [0, 0, 1, 1], [], []>} : vector<8x16xbf16>, vector<16x64xbf16>, vector<8x64xf32> -> vector<8x64xf32>
    %c0_4 = arith.constant 0 : index
    %c0_5 = arith.constant 0 : index
    %4 = vector.load %arg3[%c0_4, %c0_5] : memref<8x1xf32, #tpu.memory_space<vmem>>, vector<8x1xf32>
    %5 = vector.broadcast %4 : vector<8x1xf32> to vector<8x64xf32>
    %6 = arith.addf %3, %5 : vector<8x64xf32>
    %c0_6 = arith.constant 0 : index
    %c0_7 = arith.constant 0 : index
    %c0_8 = arith.constant 0 : index
    %7 = vector.load %arg5[%c0_6, %c0_7, %c0_8] : memref<1x8x64xf32, #tpu.memory_space<vmem>>, vector<1x8x64xf32>
    %8 = vector.shape_cast %7 : vector<1x8x64xf32> to vector<8x64xf32>
    %9 = vector.shape_cast %6 : vector<8x64xf32> to vector<1x8x64xf32>
    tpu.vector_store %arg5[%c0_6, %c0_7, %c0_8], %9 {strides = array<i32>} : memref<1x8x64xf32, #tpu.memory_space<vmem>>, vector<1x8x64xf32>,
    return
  }
  func.func @transform_0(%arg0: i32, %arg1: i32) -> (i32, i32) {
    %c0_i32 = arith.constant 0 : i32
    %c0_i32_0 = arith.constant 0 : i32
    %c0_i32_1 = arith.constant 0 : i32
    return %c0_i32, %c0_i32_0 : i32, i32
  }
  func.func @transform_1(%arg0: i32, %arg1: i32) -> (i32, i32) {
    %c0_i32 = arith.constant 0 : i32
    %c0_i32_0 = arith.constant 0 : i32
    %c0_i32_1 = arith.constant 0 : i32
    return %c0_i32, %c0_i32_0 : i32, i32
  }
  func.func @transform_2(%arg0: i32, %arg1: i32) -> (i32, i32, i32) {
    %c0_i32 = arith.constant 0 : i32
    %c0_i32_0 = arith.constant 0 : i32
    return %arg0, %c0_i32, %arg1 : i32, i32, i32
  }
  func.func @transform_3(%arg0: i32, %arg1: i32) -> (i32, i32, i32) {
    %c0_i32 = arith.constant 0 : i32
    %c0_i32_0 = arith.constant 0 : i32
    return %arg0, %c0_i32, %arg1 : i32, i32, i32
  }
}

</mosaic_0001>

<bundles_post_ra>
// kernel: sp_conv2d.1
= control target key start
LH: loop header
LB: loop body
LE: loop exit
PB: predicated region body
PF: predicated region fallthrough
CT: control target
= control target key end

     0   :  { %s436_s12 = smov 0   ;;  %s438_s13 = smov 0   ;;  %s475_s0 = inlined_call_operand.vmem [shape: bf16[8,16], index: 0, kind: input, shape index: {}]   ;;  %s476_s1 = inlined_call_operand.vmem [shape: f32[8,1], index: 1, kind: input, shape index: {}]   ;;  %s477_s2 = inlined_call_operand.vmem [shape: bf16[2,16,64], index: 2, kind: input, shape index: {}]   ;;  %s478_s3 = inlined_call_operand.vmem [shape: f32[2,8,64], index: 3, kind: output, shape index: {}]  }
   0x1   :  { %s440_s14 = smov 0  }
   0x2 LB: > { %s25_s15 = sadd.s32 1, %s407_s13  ;;  %p343_p0 = scmp.ge.s32.totalorder %s411_s14, 1  ;;  %s411_s14 = sphi %s440_s14, %s13_s14   ;;  %s407_s13 = sphi %s438_s13, %s480_s13   ;;  %s403_s12 = sphi %s436_s12, %s479_s12  }
   0x3   : > { %p27_p1 = scmp.ge.s32.totalorder %s25_s15, 2  ;;  %p156_p2 = scmp.lt.s32.totalorder %s411_s14, 3 }
   0x5   : > { %s482_s15 = smov (%p27_p1, %s25_s15), 0  ;;  %p157_p3 = pnand %p343_p0, %p156_p2 }
   0x6   : > { %p185_p4 = scmp.lt.s32.totalorder (!%p157_p3), %s403_s12, 1 }
   0x7   : > { %160 = sbr.rel (%p157_p3) target bundleno = 218 (0xda), region = 32 }
   0xc   : > { %v413_v0 = vmov 0.0   ;;  %vm414_vm0 = vmmov 0   ;;  %v204_v1 = vld [vmem:[%s476_s1] sm:$0xff]  ;;  %s484_s12 = smov (!%p185_p4, %s403_s12), 1  ;;  %v415_v2 = vmov 0   ;;  %vm216_vm1 = vcmask 130048  }
   0xd   : > { %354 = vmatprep.subr.bf16.mxu0 %v413_v0  ;;  %356 = vmatprep.mubr.msk.bf16.mxu0 %vm414_vm0, %v413_v0  ;;  %s351_s18 = sshll.u32 %s484_s12, 3  ;;  %v201_v4 = vld [vmem:[%s475_s0] sm:$0xf]  ;;  %vm260_vm2 = vcmask 523264  }
   0xe   : > { %387 = vset.pattern.permute.xlu0 %v415_v2  ;;  %s192_s21 = scalar_lea.vmem %s477_s2, %s351_s18  ;;  %s199_s26 = scalar_lea.vmem %s478_s3, %s351_s18 }
   0xf   : > { %207 = vperm.xlu0 %387, %v204_v1   ;;  %v388_v3 = vld [vmem:[%s192_s21] sm:$0xff]  }
  0x10   : > { %355 = vmatpush3.bf16.msra.mxu0 %v388_v3 }
  0x13   : > { %357 = vmatmul.mubr.msk.bf16.vlgmr.msra.gmra.mxu0 %vm216_vm1, %v201_v4 }
  0x8a   : > { %v208_v5 = vpop.permute.xlu0 %207 }
  0xd3   : > { %v254_v6 = vpop.f32.mrf.mxu0 }
  0xd4   : > { %v255_v7 = vadd.f32 %v254_v6, %v208_v5 }
  0xd5   : > { %v358_v8 = vpop.f32.mrf.mxu0 }
  0xd6   : > { %261 = vst.msk [vmem:[%s199_s26] sm:$0xff] %vm260_vm2, %v255_v7 }
  0xd7   : > { %v257_v9 = vpop.f32.mrf.mxu0 }
  0xd9   : > { %v359_v10 = vpop.f32.mrf.mxu0 }
  0xda PF: > { %s13_s14 = sadd.s32 1, %s411_s14   ;;  %s479_s12 = smov %s407_s13 }
  0xdb   : > { %p10_p5 = scmp.ge.s32.totalorder %s13_s14, 4   ;;  %s480_s13 = smov %s482_s15 }
  0xdd   :  { %12 = sbr.rel (!%p10_p5) target bundleno = 2 (0x2), region = 62 }

</bundles_post_ra>
